<compile_context>
chip_gen: v7x
topology: tpu7x:2x2x1
jax: 0.10.0
libtpu: 0.0.40
codegen_flags: <defaults>
</compile_context>

<pallas_src>
import math
import functools

import jax
import jax.numpy as jnp
from jax.experimental import pallas as pl
from jax.experimental.pallas import tpu as pltpu


# ---------------------------------------------------------------------------
# Parameter / buffer construction (deterministic, matches torch __init__)
# ---------------------------------------------------------------------------
def make_positional_encoding_table(max_len: int, d_model: int,
                                   dtype=jnp.float32) -> jnp.ndarray:
    """pe[pos, 2i]   = sin(pos * exp(2i * -ln(10000)/d_model))
       pe[pos, 2i+1] = cos(pos * exp(2i * -ln(10000)/d_model))"""
    position = jnp.arange(0.0, max_len, dtype=jnp.float32)[:, None]       # (L, 1)
    div_term = jnp.exp(
        jnp.arange(0.0, d_model, 2.0, dtype=jnp.float32)
        * (-math.log(10000.0) / d_model)
    )[None, :]                                                            # (1, D/2)
    arg = position @ div_term                                             # (L, D/2)
    pe = jnp.zeros((max_len, d_model), dtype=jnp.float32)
    pe = pe.at[:, 0::2].set(jnp.sin(arg))
    pe = pe.at[:, 1::2].set(jnp.cos(arg))
    return pe.astype(dtype)


# ---------------------------------------------------------------------------
# Kernels
# ---------------------------------------------------------------------------
def _pe_add_kernel(x_ref, pe_ref, o_ref):
    # x_ref: (1, TS, D), pe_ref: (TS, D) -> broadcast add
    o_ref[...] = x_ref[...] + pe_ref[...]


def _pe_add_dropout_kernel(x_ref, pe_ref, rbits_ref, o_ref, *, p: float):
    # Inverted dropout (train mode): keep with prob (1-p), scale by 1/(1-p).
    y = x_ref[...] + pe_ref[...]                                 # (1, TS, D)
    thresh = jnp.uint32(min(int(p * float(2 ** 32)), 2 ** 32 - 1))
    keep = rbits_ref[...] >= thresh                              # P(keep) = 1 - p
    scale = jnp.array(1.0 / (1.0 - p), dtype=y.dtype)
    o_ref[...] = jnp.where(keep, y * scale, jnp.zeros_like(y))


# ---------------------------------------------------------------------------
# Tile-size selection: keep per-block bytes <= ~1 MiB (v5e-safe), TS mult. of 8
# ---------------------------------------------------------------------------
def _choose_seq_tile(S: int, D: int, itemsize: int,
                     target_bytes: int = 1 << 20) -> int:
    if S * D * itemsize <= target_bytes:
        return S
    ts = (target_bytes // (D * itemsize)) // 8 * 8
    ts = max(8, ts)
    return min(ts, S)


# ---------------------------------------------------------------------------
# Wrapper (equivalent of PositionalEncoding.forward)
# ---------------------------------------------------------------------------
def positional_encoding_forward(x, pe_table, *, dropout_p: float,
                                training: bool = False,
                                dropout_key=None):
    """x: (B, S, D); pe_table: (max_len, D).  Returns dropout(x + pe[:S])."""
    B, S, D = x.shape
    pe_slice = pe_table[:S, :].astype(x.dtype)                    # (S, D) glue

    itemsize = jnp.dtype(x.dtype).itemsize
    TS = _choose_seq_tile(S, D, itemsize)
    ns = pl.cdiv(S, TS)

    # grid = (seq_tiles, batch): pe's block index only depends on the OUTER
    # axis, so the pe tile is not re-DMA'd for every batch element.
    x_spec = pl.BlockSpec((1, TS, D), lambda s, b: (b, s, 0))
    pe_spec = pl.BlockSpec((TS, D), lambda s, b: (s, 0))
    o_spec = pl.BlockSpec((1, TS, D), lambda s, b: (b, s, 0))
    out_shape = jax.ShapeDtypeStruct((B, S, D), x.dtype)

    cparams = pltpu.CompilerParams(
        dimension_semantics=("parallel", "parallel"))

    if (not training) or dropout_p == 0.0:
        # Eval mode: dropout is identity; kernel is just the broadcasted add.
        return pl.pallas_call(
            _pe_add_kernel,
            out_shape=out_shape,
            grid_spec=pltpu.PrefetchScalarGridSpec(
                num_scalar_prefetch=0,
                grid=(ns, B),
                in_specs=[x_spec, pe_spec],
                out_specs=o_spec,
            ),
            compiler_params=cparams,
        )(x, pe_slice)

    if dropout_p >= 1.0:
        return jnp.zeros((B, S, D), dtype=x.dtype)

    if dropout_key is None:
        dropout_key = jax.random.PRNGKey(0)
    # Random bits generated in plain JAX (portable; no TPU-only PRNG prims).
    rbits = jax.random.bits(dropout_key, (B, S, D), dtype=jnp.uint32)
    rbits_spec = pl.BlockSpec((1, TS, D), lambda s, b: (b, s, 0))

    kernel = functools.partial(_pe_add_dropout_kernel, p=float(dropout_p))
    return pl.pallas_call(
        kernel,
        out_shape=out_shape,
        grid_spec=pltpu.PrefetchScalarGridSpec(
            num_scalar_prefetch=0,
            grid=(ns, B),
            in_specs=[x_spec, pe_spec, rbits_spec],
            out_specs=o_spec,
        ),
        compiler_params=cparams,
    )(x, pe_slice, rbits)


# ---------------------------------------------------------------------------
# Demo / smoke test
# ---------------------------------------------------------------------------
if __name__ == "__main__":
    B, S, D = 2, 16, 128          # small, lane-dense (D multiple of 128)
    MAX_LEN = 64
    DROPOUT_P = 0.1

    key = jax.random.PRNGKey(0)
    key_x, key_drop = jax.random.split(key)
    x = jax.random.normal(key_x, (B, S, D), dtype=jnp.float32)

    pe_table = make_positional_encoding_table(MAX_LEN, D)
    y_ref = x + pe_table[None, :S, :]

    # Eval-mode forward (dropout = identity), matches torch module in .eval()
    y_eval = positional_encoding_forward(x, pe_table,
                                         dropout_p=DROPOUT_P, training=False)
    y_eval = jax.block_until_ready(y_eval)
    assert jnp.allclose(y_eval, y_ref, atol=1e-6), "eval-mode mismatch"

    # Train-mode forward (inverted dropout).  Torch's RNG stream cannot be
    # bit-reproduced; semantics/statistics match.
    y_train = positional_encoding_forward(x, pe_table,
                                          dropout_p=DROPOUT_P, training=True,
                                          dropout_key=key_drop)
    y_train = jax.block_until_ready(y_train)
    assert y_train.shape == (B, S, D)
    # Every kept element must equal (x + pe) / (1 - p); dropped elements are 0.
    kept = y_train != 0.0
    scaled_ref = y_ref / (1.0 - DROPOUT_P)
    assert jnp.allclose(jnp.where(kept, y_train, 0.0),
                        jnp.where(kept, scaled_ref, 0.0), atol=1e-5), \
        "train-mode kept-element mismatch"

    print("KERNEL_OK")
</pallas_src>

<mosaic_0001>
module attributes {stable_mosaic.version = 11 : i64} {
  func.func @_pe_add_kernel(%arg0: i32, %arg1: i32, %arg2: memref<1x16x128xf32, #tpu.memory_space<vmem>>, %arg3: memref<16x128xf32, #tpu.memory_space<vmem>>, %arg4: memref<1x16x128xf32, #tpu.memory_space<vmem>>) attributes {dimension_semantics = [#tpu.dimension_semantics<parallel>, #tpu.dimension_semantics<parallel>], iteration_bounds = array<i64: 1, 2>, scalar_prefetch = 0 : i64, scratch_operands = 0 : i64, tpu.core_type = #tpu.core_type<tc>, window_params = [{transform_indices = @transform_0, window_bounds = array<i64: 1, 16, 128>}, {transform_indices = @transform_1, window_bounds = array<i64: 16, 128>}, {transform_indices = @transform_2, window_bounds = array<i64: 1, 16, 128>}]} {
    %c0 = arith.constant 0 : index
    %c0_0 = arith.constant 0 : index
    %c0_1 = arith.constant 0 : index
    %0 = vector.load %arg2[%c0, %c0_0, %c0_1] : memref<1x16x128xf32, #tpu.memory_space<vmem>>, vector<1x16x128xf32>
    %c0_2 = arith.constant 0 : index
    %c0_3 = arith.constant 0 : index
    %1 = vector.load %arg3[%c0_2, %c0_3] : memref<16x128xf32, #tpu.memory_space<vmem>>, vector<16x128xf32>
    %2 = vector.shape_cast %1 : vector<16x128xf32> to vector<1x16x128xf32>
    %3 = arith.addf %0, %2 : vector<1x16x128xf32>
    %c0_4 = arith.constant 0 : index
    %c0_5 = arith.constant 0 : index
    %c0_6 = arith.constant 0 : index
    %4 = vector.load %arg4[%c0_4, %c0_5, %c0_6] : memref<1x16x128xf32, #tpu.memory_space<vmem>>, vector<1x16x128xf32>
    tpu.vector_store %arg4[%c0_4, %c0_5, %c0_6], %3 {strides = array<i32>} : memref<1x16x128xf32, #tpu.memory_space<vmem>>, vector<1x16x128xf32>,
    return
  }
  func.func @transform_0(%arg0: i32, %arg1: i32) -> (i32, i32, i32) {
    %c0_i32 = arith.constant 0 : i32
    %c0_i32_0 = arith.constant 0 : i32
    return %arg1, %arg0, %c0_i32 : i32, i32, i32
  }
  func.func @transform_1(%arg0: i32, %arg1: i32) -> (i32, i32) {
    %c0_i32 = arith.constant 0 : i32
    %c0_i32_0 = arith.constant 0 : i32
    return %arg0, %c0_i32 : i32, i32
  }
  func.func @transform_2(%arg0: i32, %arg1: i32) -> (i32, i32, i32) {
    %c0_i32 = arith.constant 0 : i32
    %c0_i32_0 = arith.constant 0 : i32
    return %arg1, %arg0, %c0_i32 : i32, i32, i32
  }
}

</mosaic_0001>

<bundles_post_ra>
// kernel: tpu_custom_call.1
= control target key start
LH: loop header
LB: loop body
LE: loop exit
PB: predicated region body
PF: predicated region fallthrough
CT: control target
= control target key end

     0   :  { %7 = vsyncpa [#allocation3], 0  ;;  %s818_s0 = inlined_call_operand.hbm [shape: f32[2,16,128], index: 0, kind: input, shape index: {}]   ;;  %s819_s1 = inlined_call_operand.hbm [shape: f32[16,128], index: 1, kind: input, shape index: {}]   ;;  %s820_s2 = inlined_call_operand.hbm [shape: f32[2,16,128], index: 2, kind: output, shape index: {}]  }
   0x1   :  { %9 = vsyncpa [#allocation3 + $0x1], 0 }
   0x2   :  { %10 = vsyncpa [#allocation6], 0 }
   0x3   :  { %11 = vsyncpa [#allocation4], 0 }
   0x4   :  { %13 = vsyncpa [#allocation4 + $0x1], 0  ;;  %s593_s9 = smov 0   ;;  %s595_s10 = smov 0  }
   0x5   :  { %s597_s11 = smov 0   ;;  %s599_s12 = smov 0  }
   0x6   :  { %s601_s13 = smov 0   ;;  %s603_s14 = smov 0  }
   0x7 LB: > { %s329_s15 = sadd.s32 4294967295, %s569_s14   ;;  %s330_s16 = sadd.s32 4294967294, %s569_s14   ;;  %s569_s14 = sphi %s603_s14, %s19_s14   ;;  %s565_s13 = sphi %s601_s13, %s844_s13   ;;  %s561_s12 = sphi %s599_s12, %s843_s12   ;;  %s557_s11 = sphi %s597_s11, %s842_s11   ;;  %s553_s10 = sphi %s595_s10, %s841_s10   ;;  %s549_s9 = sphi %s593_s9, %s840_s9  }
   0x8   : > { %p53_p0 = scmp.ne.s32.totalorder %s553_s10, %s549_s9  ;;  %p627_p1 = scmp.eq.s32.totalorder %s329_s15, 0 }
   0x9   : > { %p631_p2 = scmp.eq.s32.totalorder %s329_s15, 1  ;;  %p111_p3 = scmp.eq.s32.totalorder %s330_s16, 1 }
   0xa   : > { %s825_s17 = scalar_select %p627_p1, 1, 0 }
   0xb   : > { %s826_s18 = scalar_select %p631_p2, 1, 0 }
   0xc   : > { %p637_p4 = por %p627_p1, %p53_p0  ;;  %p331_p5 = scmp.ge.s32.totalorder %s569_s14, 1 }
   0xd   : > { %p642_p6 = por %p111_p3, %p53_p0  ;;  %p118_p7 = scmp.lt.s32.totalorder %s569_s14, 3 }
   0xe   : > { %s827_s19 = scalar_select %p637_p4, 1, 0 }
   0xf   : > { %s828_s20 = scalar_select %p642_p6, 1, 0 }
  0x10   : > { %p647_p8 = pnand %p331_p5, %p118_p7  ;;  %s571_s22 = smov [#allocation5]  }
  0x11   : > { %s133_s23 = sshll.u32 %s571_s22, 4  ;;  %s28_s25 = sadd.s32 1, %s565_s13  ;;  %s134_s23 = int_to_ptr.vmem [resolvable:$true] %s133_s23 }
  0x12   : > { %s829_s21 = scalar_select %p647_p8, 1, 0 }
  0x13   : > { %p356_p9 = pneg %p647_p8  ;;  %s425_s28 = scalar_lea.hbm %s819_s1, 256 }
  0x14   : > { %p426_p12 = scmp.ne.s32.totalorder %s819_s1, %s425_s28  ;;  %p432_p5 = scmp.lt.u32.totalorder %s425_s28, %s819_s1 }
  0x15   : > { %p656_p11 = pnand %p356_p9, %p627_p1 }
  0x17   : > { %p427_p13 = pneg %p656_p11 }
  0x19   : > { %p428_p0 = pnand %p427_p13, %p426_p12 }
  0x1b   : > { %p429_p3 = pneg %p428_p0 }
  0x1d   : > { %p434_p7 = pnand %p432_p5, %p429_p3 }
  0x1f   : > { %437 = shalt.err (!%p434_p7)
}
  0x20   : > { %s438_s5 = scalar_lea.vmem %s134_s23, 256  ;;  %p446_p1 = scmp.lt.s32.totalorder %s134_s23, %s134_s23 }
  0x21   : > { %p439_p9 = scmp.ne.s32.totalorder %s134_s23, %s438_s5  ;;  %p447_p4 = scmp.lt.s32.totalorder %s438_s5, %s438_s5 }
  0x23   : > { %p441_p10 = pnand %p439_p9, %p427_p13  ;;  %p448_p8 = por %p447_p4, %p446_p1 }
  0x25   : > { %p442_p6 = pneg %p441_p10 }
  0x27   : > { %p449_p2 = pnand %p448_p8, %p442_p6 }
  0x29   : > { %452 = shalt.err (!%p449_p2)
}
  0x2a   : > { %s572_s6 = smov 128   ;;  %s573_s7 = smov 8  }
  0x2b   : > { %359 = dma.hbm_to_vmem [thread:$0]  (!%p656_p11), %s819_s1, 256, %s134_s23, [#allocation6], %s572_s6, %s572_s6, %s573_s7  }
  0x2c   : > { %p29_p1 = scmp.ge.s32.totalorder %s28_s25, 2  ;;  %s40_s16 = sadd.s32 1, %s557_s11 }
  0x2d   : > { %p47_p2 = scmp.ne.s32.totalorder %s557_s11, %s553_s10  ;;  %p48_p4 = scmp.eq.s32.totalorder %s569_s14, 0 }
  0x2e   : > { %s846_s25 = smov (%p29_p1, %s28_s25), 0  ;;  %p832_p8 = scmp.ne.s32.totalorder %s826_s18, 0 }
  0x2f   : > { %p686_p6 = por %p48_p4, %p47_p2  ;;  %s35_s26 = ssub.s32 %s565_s13, %s846_s25 }
  0x30   : > { %p692_p10 = por %p832_p8, %p47_p2  ;;  %p369_p12 = scmp.lt.s32.totalorder %s569_s14, 2 }
  0x31   : > { %p38_p11 = scmp.eq.s32.totalorder %s35_s26, 0  ;;  %s147_s23 = sand.u32 1, %s557_s11  }
  0x32   : > { %s334_s27 = sshll.u32 %s147_s23, 4  ;;  %s346_s29 = sshll.u32 %s565_s13, 8 }
  0x33   : > { %s701_s28 = scalar_select %p38_p11, %s557_s11, %s40_s16  }
  0x34   : > { %s707_s4 = scalar_lea.hbm %s818_s0, %s346_s29  ;;  %s151_s18 = scalar_lea.vmem [#allocation2], %s334_s27 }
  0x35   : > { %s160_s5 = sshll.u32 %s151_s18, 4  ;;  %p713_p13 = pnand %p369_p12, %p686_p6  ;;  %s709_s5 = int_to_ptr.vmem [resolvable:$true] %s160_s5 }
  0x36   : > { %s717_s15 = scalar_lea.sflag [#allocation3], %s147_s23  ;;  %s453_s16 = scalar_lea.hbm %s707_s4, 256 }
  0x37   : > { %p454_p0 = scmp.ne.s32.totalorder %s707_s4, %s453_s16  ;;  %p455_p3 = pneg %p713_p13 }
  0x38   : > { %s458_s22 = scalar_lea.hbm %s818_s0, 512  ;;  %p459_p9 = scmp.lt.u32.totalorder %s707_s4, %s818_s0 }
  0x39   : > { %p456_p5 = pnand %p455_p3, %p454_p0  ;;  %p460_p1 = scmp.lt.u32.totalorder %s458_s22, %s453_s16 }
  0x3a   : > { %p462_p4 = scmp.lt.u32.totalorder %s453_s16, %s707_s4 }
  0x3b   : > { %p457_p7 = pneg %p456_p5  ;;  %p461_p2 = por %p460_p1, %p459_p9 }
  0x3d   : > { %p463_p6 = por %p462_p4, %p461_p2 }
  0x3f   : > { %p464_p8 = pnand %p463_p6, %p457_p7 }
  0x41   : > { %467 = shalt.err (!%p464_p8)
}
  0x42   : > { %s468_s23 = scalar_lea.vmem %s709_s5, 256  ;;  %s574_s3 = smov [#allocation2]  }
  0x43   : > { %p469_p12 = scmp.ne.s32.totalorder %s709_s5, %s468_s23  ;;  %s473_s18 = sshll.u32 %s574_s3, 4  ;;  %s474_s18 = int_to_ptr.vmem [resolvable:$false] %s473_s18 }
  0x44   : > { %s475_s26 = scalar_lea.vmem %s474_s18, 512  ;;  %p476_p5 = scmp.lt.s32.totalorder %s709_s5, %s474_s18 }
  0x45   : > { %p471_p11 = pnand %p469_p12, %p455_p3  ;;  %p477_p9 = scmp.lt.s32.totalorder %s475_s26, %s468_s23 }
  0x47   : > { %p472_p0 = pneg %p471_p11  ;;  %p478_p1 = por %p477_p9, %p476_p5 }
  0x49   : > { %p479_p2 = pnand %p478_p1, %p472_p0 }
  0x4b   : > { %482 = shalt.err (!%p479_p2)
}
  0x4c   : > { %363 = dma.hbm_to_vmem [thread:$0]  (!%p713_p13), %s707_s4, 256, %s709_s5, %s717_s15, %s572_s6, %s572_s6, %s573_s7  }
  0x4d   : > { %p835_p3 = scmp.ne.s32.totalorder %s829_s21, 0 }
  0x4e   : > { %s751_s16 = sand.u32 (!%p835_p3), 1, %s553_s10   ;;  %p836_p7 = scmp.ne.s32.totalorder (!%p835_p3), %s827_s19, 0 }
  0x4f   : > { %172 = sbr.rel (%p835_p3) target bundleno = 116 (0x74), region = 28  ;;  %s338_s27 = sshll.u32 (!%p835_p3), %s751_s16, 4 }
  0x50   : > { %s175_s22 = scalar_lea.sflag (!%p835_p3), [#allocation3], %s751_s16  ;;  %s178_s29 = scalar_lea.vmem (!%p835_p3), [#allocation2], %s338_s27 }
  0x56   : > { %536 = dma.done.wait (%p836_p7), %s175_s22, 256  }
  0x57   : > { %538 = vsyncadd (%p836_p7), %s175_s22, 4294967040  ;;  %p837_p4 = scmp.ne.s32.totalorder %s825_s17, 0 }
  0x59   : > { %540 = dma.done.wait (%p837_p4), [#allocation6], 256  }
  0x5a   : > { %542 = vsyncadd (%p837_p4), [#allocation6], 4294967040  ;;  %s202_s21 = scalar_lea.vmem [#allocation7], %s338_s27  ;;  %s347_s7 = sshll.u32 %s561_s12, 8  ;;  %v206_v0 = vld [vmem:[%s178_s29] sm:$0xff]  ;;  %v207_v2 = vld [vmem:[%s178_s29 + $0x8] sm:$0xff] }
  0x5b   : > { %s230_s6 = sshll.u32 %s202_s21, 4  ;;  %v208_v1 = vld [vmem:[#allocation5] sm:$0xff]  ;;  %v209_v4 = vld [vmem:[#allocation5 + $0x8] sm:$0xff]  ;;  %s769_s17 = scalar_lea.hbm %s820_s2, %s347_s7  ;;  %s764_s6 = int_to_ptr.vmem [resolvable:$true] %s230_s6 }
  0x5c   : > { %v210_v3 = vadd.f32 %v208_v1, %v206_v0  ;;  %v211_v5 = vadd.f32 %v209_v4, %v207_v2  ;;  %s215_s5 = scalar_lea.sflag [#allocation4], %s751_s16  ;;  %s483_s12 = scalar_lea.vmem %s764_s6, 256 }
  0x5d   : > { %p484_p13 = scmp.ne.s32.totalorder %s764_s6, %s483_s12  ;;  %s575_s8 = smov [#allocation7]  }
  0x5e   : > { %212 = vst [vmem:[%s202_s21] sm:$0xff] %v210_v3  ;;  %213 = vst [vmem:[%s202_s21 + $0x8] sm:$0xff] %v211_v5  ;;  %s487_s15 = sshll.u32 %s575_s8, 4  ;;  %s488_s15 = int_to_ptr.vmem [resolvable:$false] %s487_s15 }
  0x5f   : > { %p485_p6 = pnand %p484_p13, %p692_p10  ;;  %s489_s30 = scalar_lea.vmem %s488_s15, 512 }
  0x60   : > { %p490_p12 = scmp.lt.s32.totalorder %s764_s6, %s488_s15  ;;  %p491_p11 = scmp.lt.s32.totalorder %s489_s30, %s483_s12 }
  0x61   : > { %p486_p8 = pneg %p485_p6 }
  0x62   : > { %p492_p0 = por %p491_p11, %p490_p12 }
  0x64   : > { %p493_p5 = pnand %p492_p0, %p486_p8 }
  0x66   : > { %496 = shalt.err (!%p493_p5)
}
  0x67   : > { %s497_s23 = scalar_lea.hbm %s769_s17, 256  ;;  %s501_s26 = scalar_lea.hbm %s820_s2, 512 }
  0x68   : > { %p498_p9 = scmp.ne.s32.totalorder %s769_s17, %s497_s23  ;;  %p502_p3 = scmp.lt.u32.totalorder %s769_s17, %s820_s2 }
  0x69   : > { %p503_p7 = scmp.lt.u32.totalorder %s501_s26, %s497_s23  ;;  %p505_p13 = scmp.lt.u32.totalorder %s497_s23, %s769_s17 }
  0x6a   : > { %p499_p1 = pnand %p498_p9, %p692_p10 }
  0x6b   : > { %p504_p4 = por %p503_p7, %p502_p3 }
  0x6c   : > { %p500_p2 = pneg %p499_p1 }
  0x6d   : > { %p506_p6 = por %p505_p13, %p504_p4 }
  0x6f   : > { %p507_p8 = pnand %p506_p6, %p500_p2 }
  0x71   : > { %510 = shalt.err (!%p507_p8)
}
  0x72   : > { %s576_s29 = smov 128   ;;  %s577_s21 = smov 8  }
  0x73   : > { %354 = dma.vmem_to_hbm [thread:$0]  (%p692_p10), %s764_s6, 256, %s769_s17, %s215_s5, %s576_s29, %s576_s29, %s577_s21  }
  0x74 PF: > { %s245_s7 = sand.u32 1, %s549_s9   ;;  %p838_p12 = scmp.ne.s32.totalorder %s828_s20, 0 }
  0x75   : > { %p839_p11 = scmp.ge.s32.totalorder %s569_s14, 2  ;;  %s246_s19 = scalar_lea.sflag [#allocation4], %s245_s7 }
  0x77   : > { %p365_p0 = pnand %p839_p11, %p838_p12 }
  0x79   : > { %544 = dma.done.wait (!%p365_p0), %s246_s19, 256  }
  0x7a   : > { %546 = vsyncadd (!%p365_p0), %s246_s19, 4294967040  ;;  %s19_s14 = sadd.s32 1, %s569_s14   ;;  %s840_s9 = smov %s553_s10 }
  0x7b   : > { %p16_p5 = scmp.ge.s32.totalorder %s19_s14, 4   ;;  %s841_s10 = smov %s557_s11 }
  0x7c   : > { %s842_s11 = smov %s701_s28  ;;  %s843_s12 = smov %s565_s13 }
  0x7d   : > { %s844_s13 = smov %s846_s25  ;;  %18 = sbr.rel (!%p16_p5) target bundleno = 7 (0x7), region = 78 }
  0x84   :  { %251 = vsyncpa [#allocation3], 1 }
  0x85   :  { %253 = vsyncpa [#allocation3 + $0x1], 1 }
  0x86   :  { %254 = vsyncpa [#allocation6], 1 }
  0x87   :  { %255 = vsyncpa [#allocation4], 1 }
  0x88   :  { %257 = vsyncpa [#allocation4 + $0x1], 1 }

</bundles_post_ra>
